<compile_context>
chip_gen: v7x
topology: tpu7x:2x2x1
jax: 0.10.0
libtpu: 0.0.40
codegen_flags: <defaults>
</compile_context>

<pallas_src>
import jax
import jax.numpy as jnp
from jax.experimental import pallas as pl
from jax.experimental.pallas import tpu as pltpu

OUT_FEATURES = 5
MAX_TILE_M = 8192  # keeps double-buffered VMEM footprint ~16-20 MiB on every gen


def mlp_kernel(x_ref, w1_ref, b1_ref, w23_ref, b23_ref, w4_ref, b4_ref, out_ref):
    x = x_ref[...]                                           # (tile_m, 4)

    # Linear(4,32) -> ReLU
    h1 = jnp.dot(x, w1_ref[...], preferred_element_type=jnp.float32) + b1_ref[...]
    h1 = jnp.maximum(h1, 0.0)

    # Fused Linear(32,64)@Linear(64,32) == Linear(32,32), then ReLU
    h2 = jnp.dot(h1, w23_ref[...], preferred_element_type=jnp.float32) + b23_ref[...]
    h2 = jnp.maximum(h2, 0.0)

    # Linear(32,5): store exactly the 5 real output columns (no lane padding)
    out = jnp.dot(h2, w4_ref[...], preferred_element_type=jnp.float32) + b4_ref[...]
    out_ref[...] = out.astype(out_ref.dtype)


def _round8_up(n):
    return ((n + 7) // 8) * 8


def spatial_relationship_forward(bbox_coords, params, *, tile_m=MAX_TILE_M):
    """bbox_coords: (N, 4) float32. Returns (N, 5) logits."""
    w1, b1, w2, b2, w3, b3, w4, b4 = params

    # --- wrapper-side algebraic fusion of layers 2 & 3 (no ReLU between them).
    # Numerically this reassociates the fp32 accumulation; verified vs the
    # unfused reference with tolerances, not bitwise.
    w23 = jnp.dot(w2, w3, preferred_element_type=jnp.float32)          # (32, 32)
    b23 = jnp.dot(b2, w3, preferred_element_type=jnp.float32) + b3     # (1, 32)

    N = bbox_coords.shape[0]

    # --- tile sizing:
    #   * multiple of 8 (sublane rule), at least 8
    #   * no larger than the (rounded-up) batch
    #   * grid gets >= 2 steps so v7x's two TensorCores both get work
    #   * capped at MAX_TILE_M to bound the VMEM footprint on every generation
    tile_m = min(tile_m, MAX_TILE_M)
    tile_m = max(8, min(_round8_up(tile_m) if tile_m % 8 else tile_m,
                        _round8_up(N),
                        max(8, _round8_up(pl.cdiv(N, 2)))))
    tile_m = (tile_m // 8) * 8

    n_pad = pl.cdiv(N, tile_m) * tile_m
    x = bbox_coords
    if n_pad != N:
        x = jnp.pad(x, ((0, n_pad - N), (0, 0)))

    grid = (n_pad // tile_m,)

    # VMEM: each (tile_m, <=128) block occupies tile_m*128*4 B once lane-padded;
    # double-buffered input + output blocks, plus a few hundred KiB of weights.
    block_vmem = tile_m * 128 * 4
    vmem_limit = 2 * 2 * block_vmem + (4 << 20)

    def full_spec(shape):
        # whole-array block, same block every grid step (weights stay resident)
        return pl.BlockSpec(shape, lambda i: (0,) * len(shape))

    out = pl.pallas_call(
        mlp_kernel,
        out_shape=jax.ShapeDtypeStruct((n_pad, OUT_FEATURES), jnp.float32),
        grid_spec=pltpu.PrefetchScalarGridSpec(
            num_scalar_prefetch=0,
            grid=grid,
            in_specs=[
                pl.BlockSpec((tile_m, 4), lambda i: (i, 0)),   # batch tile
                full_spec(w1.shape), full_spec(b1.shape),
                full_spec(w23.shape), full_spec(b23.shape),
                full_spec(w4.shape), full_spec(b4.shape),
            ],
            # last dim (5) equals the full array dim -> exempt from the 128 rule
            out_specs=pl.BlockSpec((tile_m, OUT_FEATURES), lambda i: (i, 0)),
        ),
        compiler_params=pltpu.CompilerParams(
            # "parallel" batch axis -> shards grid steps across v7x's two TCs.
            dimension_semantics=("parallel",),
            vmem_limit_bytes=vmem_limit,
        ),
    )(x, w1, b1, w23, b23, w4, b4)

    if n_pad != N:
        out = out[:N]
    return out


def init_params(key):
    """Deterministic init matching nn.Linear default: U(-1/sqrt(fan_in), 1/sqrt(fan_in))."""
    def linear(k, fan_in, fan_out):
        kw, kb = jax.random.split(k)
        bound = 1.0 / jnp.sqrt(fan_in)
        w = jax.random.uniform(kw, (fan_in, fan_out), jnp.float32, -bound, bound)
        b = jax.random.uniform(kb, (1, fan_out), jnp.float32, -bound, bound)
        return w, b

    k1, k2, k3, k4 = jax.random.split(key, 4)
    w1, b1 = linear(k1, 4, 32)
    w2, b2 = linear(k2, 32, 64)
    w3, b3 = linear(k3, 64, 32)
    w4, b4 = linear(k4, 32, 5)
    return (w1, b1, w2, b2, w3, b3, w4, b4)


def reference_forward(x, params):
    """Unfused reference, matches the PyTorch module exactly."""
    w1, b1, w2, b2, w3, b3, w4, b4 = params
    h = jnp.maximum(x @ w1 + b1, 0.0)
    enc = h @ w2 + b2
    h2 = jnp.maximum(enc @ w3 + b3, 0.0)
    return h2 @ w4 + b4


if __name__ == "__main__":
    key = jax.random.PRNGKey(0)
    kp, kx1, kx2 = jax.random.split(key, 3)
    params = init_params(kp)

    # Case 1: small, 8-aligned batch (tile cap -> 2 grid steps).
    N1 = 16
    bbox1 = jax.random.uniform(kx1, (N1, 4), jnp.float32)   # (x1, y1, x2, y2)
    out1 = jax.block_until_ready(spatial_relationship_forward(bbox1, params))
    ref1 = reference_forward(bbox1, params)
    assert out1.shape == (N1, OUT_FEATURES)
    assert jnp.allclose(out1, ref1, atol=1e-5, rtol=1e-5), "mismatch vs reference (N=16)"

    # Case 2: batch not a multiple of 8 -> exercises wrapper-side row padding.
    N2 = 19
    bbox2 = jax.random.uniform(kx2, (N2, 4), jnp.float32)
    out2 = jax.block_until_ready(spatial_relationship_forward(bbox2, params))
    ref2 = reference_forward(bbox2, params)
    assert out2.shape == (N2, OUT_FEATURES)
    assert jnp.allclose(out2, ref2, atol=1e-5, rtol=1e-5), "mismatch vs reference (N=19)"

    print("KERNEL_OK")
</pallas_src>

<mosaic_0001>
module attributes {stable_mosaic.version = 11 : i64} {
  func.func @mlp_kernel(%arg0: i32, %arg1: memref<8x4xf32, #tpu.memory_space<vmem>>, %arg2: memref<4x32xf32, #tpu.memory_space<vmem>>, %arg3: memref<1x32xf32, #tpu.memory_space<vmem>>, %arg4: memref<32x32xf32, #tpu.memory_space<vmem>>, %arg5: memref<1x32xf32, #tpu.memory_space<vmem>>, %arg6: memref<32x5xf32, #tpu.memory_space<vmem>>, %arg7: memref<1x5xf32, #tpu.memory_space<vmem>>, %arg8: memref<8x5xf32, #tpu.memory_space<vmem>>) attributes {dimension_semantics = [#tpu.dimension_semantics<parallel>], iteration_bounds = array<i64: 2>, scalar_prefetch = 0 : i64, scratch_operands = 0 : i64, tpu.core_type = #tpu.core_type<tc>, window_params = [{transform_indices = @transform_0, window_bounds = array<i64: 8, 4>}, {pipeline_mode = #tpu.pipeline_mode<synchronous>, transform_indices = @transform_1, window_bounds = array<i64: 4, 32>}, {pipeline_mode = #tpu.pipeline_mode<synchronous>, transform_indices = @transform_2, window_bounds = array<i64: 1, 32>}, {pipeline_mode = #tpu.pipeline_mode<synchronous>, transform_indices = @transform_3, window_bounds = array<i64: 32, 32>}, {pipeline_mode = #tpu.pipeline_mode<synchronous>, transform_indices = @transform_4, window_bounds = array<i64: 1, 32>}, {pipeline_mode = #tpu.pipeline_mode<synchronous>, transform_indices = @transform_5, window_bounds = array<i64: 32, 5>}, {pipeline_mode = #tpu.pipeline_mode<synchronous>, transform_indices = @transform_6, window_bounds = array<i64: 1, 5>}, {transform_indices = @transform_7, window_bounds = array<i64: 8, 5>}]} {
    %c0 = arith.constant 0 : index
    %c0_0 = arith.constant 0 : index
    %0 = vector.load %arg1[%c0, %c0_0] : memref<8x4xf32, #tpu.memory_space<vmem>>, vector<8x4xf32>
    %c0_1 = arith.constant 0 : index
    %c0_2 = arith.constant 0 : index
    %1 = vector.load %arg2[%c0_1, %c0_2] : memref<4x32xf32, #tpu.memory_space<vmem>>, vector<4x32xf32>
    %cst = arith.constant dense<0.000000e+00> : vector<8x32xf32>
    %2 = tpu.matmul %0, %1, %cst {dimension_numbers = #tpu.dot_dimension_numbers<[1], [0], [0], [1], [0, 0, 1, 1], [], []>} : vector<8x4xf32>, vector<4x32xf32>, vector<8x32xf32> -> vector<8x32xf32>
    %c0_3 = arith.constant 0 : index
    %c0_4 = arith.constant 0 : index
    %3 = vector.load %arg3[%c0_3, %c0_4] : memref<1x32xf32, #tpu.memory_space<vmem>>, vector<1x32xf32>
    %4 = vector.broadcast %3 : vector<1x32xf32> to vector<8x32xf32>
    %5 = arith.addf %2, %4 : vector<8x32xf32>
    %cst_5 = arith.constant 0.000000e+00 : f32
    %6 = vector.broadcast %cst_5 : f32 to vector<8x32xf32>
    %7 = arith.maximumf %5, %6 : vector<8x32xf32>
    %c0_6 = arith.constant 0 : index
    %c0_7 = arith.constant 0 : index
    %8 = vector.load %arg4[%c0_6, %c0_7] : memref<32x32xf32, #tpu.memory_space<vmem>>, vector<32x32xf32>
    %cst_8 = arith.constant dense<0.000000e+00> : vector<8x32xf32>
    %9 = tpu.matmul %7, %8, %cst_8 {dimension_numbers = #tpu.dot_dimension_numbers<[1], [0], [0], [1], [0, 0, 1, 1], [], []>} : vector<8x32xf32>, vector<32x32xf32>, vector<8x32xf32> -> vector<8x32xf32>
    %c0_9 = arith.constant 0 : index
    %c0_10 = arith.constant 0 : index
    %10 = vector.load %arg5[%c0_9, %c0_10] : memref<1x32xf32, #tpu.memory_space<vmem>>, vector<1x32xf32>
    %11 = vector.broadcast %10 : vector<1x32xf32> to vector<8x32xf32>
    %12 = arith.addf %9, %11 : vector<8x32xf32>
    %cst_11 = arith.constant 0.000000e+00 : f32
    %13 = vector.broadcast %cst_11 : f32 to vector<8x32xf32>
    %14 = arith.maximumf %12, %13 : vector<8x32xf32>
    %c0_12 = arith.constant 0 : index
    %c0_13 = arith.constant 0 : index
    %15 = vector.load %arg6[%c0_12, %c0_13] : memref<32x5xf32, #tpu.memory_space<vmem>>, vector<32x5xf32>
    %cst_14 = arith.constant dense<0.000000e+00> : vector<8x5xf32>
    %16 = tpu.matmul %14, %15, %cst_14 {dimension_numbers = #tpu.dot_dimension_numbers<[1], [0], [0], [1], [0, 0, 1, 1], [], []>} : vector<8x32xf32>, vector<32x5xf32>, vector<8x5xf32> -> vector<8x5xf32>
    %c0_15 = arith.constant 0 : index
    %c0_16 = arith.constant 0 : index
    %17 = vector.load %arg7[%c0_15, %c0_16] : memref<1x5xf32, #tpu.memory_space<vmem>>, vector<1x5xf32>
    %18 = vector.broadcast %17 : vector<1x5xf32> to vector<8x5xf32>
    %19 = arith.addf %16, %18 : vector<8x5xf32>
    %c0_17 = arith.constant 0 : index
    %c0_18 = arith.constant 0 : index
    %20 = vector.load %arg8[%c0_17, %c0_18] : memref<8x5xf32, #tpu.memory_space<vmem>>, vector<8x5xf32>
    tpu.vector_store %arg8[%c0_17, %c0_18], %19 {strides = array<i32>} : memref<8x5xf32, #tpu.memory_space<vmem>>, vector<8x5xf32>,
    return
  }
  func.func @transform_0(%arg0: i32) -> (i32, i32) {
    %c0_i32 = arith.constant 0 : i32
    %c0_i32_0 = arith.constant 0 : i32
    return %arg0, %c0_i32 : i32, i32
  }
  func.func @transform_1(%arg0: i32) -> (i32, i32) {
    %c0_i32 = arith.constant 0 : i32
    %c0_i32_0 = arith.constant 0 : i32
    %c0_i32_1 = arith.constant 0 : i32
    return %c0_i32, %c0_i32_0 : i32, i32
  }
  func.func @transform_2(%arg0: i32) -> (i32, i32) {
    %c0_i32 = arith.constant 0 : i32
    %c0_i32_0 = arith.constant 0 : i32
    %c0_i32_1 = arith.constant 0 : i32
    return %c0_i32, %c0_i32_0 : i32, i32
  }
  func.func @transform_3(%arg0: i32) -> (i32, i32) {
    %c0_i32 = arith.constant 0 : i32
    %c0_i32_0 = arith.constant 0 : i32
    %c0_i32_1 = arith.constant 0 : i32
    return %c0_i32, %c0_i32_0 : i32, i32
  }
  func.func @transform_4(%arg0: i32) -> (i32, i32) {
    %c0_i32 = arith.constant 0 : i32
    %c0_i32_0 = arith.constant 0 : i32
    %c0_i32_1 = arith.constant 0 : i32
    return %c0_i32, %c0_i32_0 : i32, i32
  }
  func.func @transform_5(%arg0: i32) -> (i32, i32) {
    %c0_i32 = arith.constant 0 : i32
    %c0_i32_0 = arith.constant 0 : i32
    %c0_i32_1 = arith.constant 0 : i32
    return %c0_i32, %c0_i32_0 : i32, i32
  }
  func.func @transform_6(%arg0: i32) -> (i32, i32) {
    %c0_i32 = arith.constant 0 : i32
    %c0_i32_0 = arith.constant 0 : i32
    %c0_i32_1 = arith.constant 0 : i32
    return %c0_i32, %c0_i32_0 : i32, i32
  }
  func.func @transform_7(%arg0: i32) -> (i32, i32) {
    %c0_i32 = arith.constant 0 : i32
    %c0_i32_0 = arith.constant 0 : i32
    return %arg0, %c0_i32 : i32, i32
  }
}

</mosaic_0001>

<bundles_post_ra>
// kernel: tpu_custom_call.1
= control target key start
LH: loop header
LB: loop body
LE: loop exit
PB: predicated region body
PF: predicated region fallthrough
CT: control target
= control target key end

     0   :  { %s716_s24 = smov 0   ;;  %s779_s0 = inlined_call_operand.vmem [shape: f32[16,4], index: 0, kind: input, shape index: {}]   ;;  %s780_s1 = inlined_call_operand.vmem [shape: f32[4,32], index: 1, kind: input, shape index: {}]   ;;  %s781_s2 = inlined_call_operand.vmem [shape: f32[1,32], index: 2, kind: input, shape index: {}]   ;;  %s782_s3 = inlined_call_operand.vmem [shape: f32[32,32], index: 3, kind: input, shape index: {}]   ;;  %s783_s4 = inlined_call_operand.vmem [shape: f32[1,32], index: 4, kind: input, shape index: {}]   ;;  %s784_s5 = inlined_call_operand.vmem [shape: f32[32,5], index: 5, kind: input, shape index: {}]   ;;  %s785_s6 = inlined_call_operand.vmem [shape: f32[1,5], index: 6, kind: input, shape index: {}]   ;;  %s786_s7 = inlined_call_operand.vmem [shape: f32[16,5], index: 7, kind: output, shape index: {}]  }
   0x1 LB: > { %s587_s25 = sadd.s32 4294967295, %s671_s24   ;;  %p591_p0 = scmp.ge.s32.totalorder %s671_s24, 1  ;;  %s671_s24 = sphi %s716_s24, %s17_s24  }
   0x2   : > { %p236_p1 = scmp.lt.s32.totalorder %s671_s24, 3 }
   0x4   : > { %p237_p2 = pnand %p591_p0, %p236_p1 }
   0x5   : > { %v275_v0 = vld [vmem:[%s780_s1] sm:$0xf] (!%p237_p2)  ;;  %vm287_vm0 = vcmask (!%p237_p2), 1043456   ;;  %p266_p3 = scmp.lt.s32.totalorder (!%p237_p2), %s587_s25, 1  ;;  %v673_v1 = vmov (!%p237_p2), 0.0   ;;  %vm674_vm1 = vmmov (!%p237_p2), 0  }
   0x6   : > { %240 = sbr.rel (%p237_p2) target bundleno = 664 (0x298), region = 48  ;;  %615 = vmatprep.subr.mxu0 (!%p237_p2), %v673_v1  ;;  %617 = vmatprep.mubr.msk.f32.mxu0 (!%p237_p2), %vm674_vm1, %v673_v1  ;;  %v362_v2 = vld [vmem:[%s782_s3] sm:$0xff] (!%p237_p2)  ;;  %v363_v3 = vld [vmem:[%s782_s3 + $0x8] sm:$0xff] (!%p237_p2)  ;;  %v675_v4 = vmov (!%p237_p2), 0.0|0.0   ;;  %vm283_vm2 = vcmask (!%p237_p2), 31744   ;;  %v364_v7 = vld [vmem:[%s782_s3 + $0x10] sm:$0xff] (!%p237_p2) }
   0x7   : > { %616 = vmatpush3.msk.msra.mxu0 (!%p237_p2), %vm287_vm0, %v275_v0  ;;  %642 = vmatprep.subr.bf16.mxu1 (!%p237_p2), %v675_v4  ;;  %v643_v5 = vpack.c.bf16 (!%p237_p2), %v363_v3, %v362_v2  ;;  %v365_v8 = vld [vmem:[%s782_s3 + $0x18] sm:$0xff] (!%p237_p2)  ;;  %v448_v10 = vld [vmem:[%s784_s5] sm:$0xff] (!%p237_p2)  ;;  %v449_v11 = vld [vmem:[%s784_s5 + $0x8] sm:$0xff] (!%p237_p2)  ;;  %vm373_vm3 = vcmask (!%p237_p2), 261120   ;;  %vm532_vm4 = vcmask (!%p237_p2), 39936  }
   0x8   : > { %628 = vmatprep.mubr.msk.f32.mxu1 (!%p237_p2), %vm674_vm1, %v673_v1  ;;  %648 = vmatprep.subr.bf16.mxu0 (!%p237_p2), %v675_v4  ;;  %v646_v9 = vpack.c.bf16 (!%p237_p2), %v365_v8, %v364_v7  ;;  %v649_v12 = vpack.c.bf16 (!%p237_p2), %v449_v11, %v448_v10  ;;  %v594_v13 = vld [vmem:[%s781_s2] ss:$0 sm:$0xff] (!%p237_p2)  ;;  %v450_v18 = vld [vmem:[%s784_s5 + $0x10] sm:$0xff] (!%p237_p2)  ;;  %v451_v19 = vld [vmem:[%s784_s5 + $0x18] sm:$0xff] (!%p237_p2) }
   0x9   : > { %644 = vmatpush3.bf16.msra.mxu1 (!%p237_p2), %v643_v5  ;;  %v652_v20 = vpack.c.bf16 (!%p237_p2), %v451_v19, %v450_v18  ;;  %v597_v21 = vld [vmem:[%s783_s4] ss:$0 sm:$0xff] (!%p237_p2) }
   0xa   : > { %645 = vmatprep.subr.bf16.mxu1 (!%p237_p2), %v675_v4  ;;  %v599_v26 = vld [vmem:[%s785_s6] ss:$0 sm:$0xff] (!%p237_p2) }
   0xd   : > { %s788_s25 = smov (!%p266_p3, %s587_s25), 1  ;;  %647 = vmatpush3.bf16.msra.mxu1 %v646_v9 }
   0xe   : > { %s592_s9 = sshll.u32 %s788_s25, 3 }
   0xf   : > { %s269_s12 = scalar_lea.vmem %s779_s0, %s592_s9  ;;  %s273_s13 = scalar_lea.vmem %s786_s7, %s592_s9 }
  0x10   : > { %v274_v6 = vld [vmem:[%s269_s12] sm:$0xff] }
  0x11   : > { %618 = vmatmul.mubr.msk.f32.vlgmr.msra.gmra.mrb[0].mxu0 %vm283_vm2, %v274_v6 }
  0x12   : > { %639 = vmatprep.mubr.msk.f32.mxu0 %vm674_vm1, %v673_v1  ;;  %650 = vmatpush3.bf16.msra.mxu0 %v649_v12 }
  0x13   : > { %651 = vmatprep.subr.bf16.mxu0 %v675_v4 }
  0x16   : > { %653 = vmatpush3.bf16.msra.mxu0 %v652_v20 }
  0xe4   : > { %v357_v14 = vpop.f32.mrb[0].mxu0 }
  0xe5   : > { %v358_v15 = vadd.f32 %v594_v13, %v357_v14  ;;  %v619_v16 = vpop.f32.mrb[1].mxu0 }
  0xe7   : > { %v361_v17 = vmax.f32 %v358_v15, 0.0 }
  0xe9   : > { %629 = vmatmul.mubr.msk.f32.vlgmr.msra.gmra.mrb[0].mxu1 %vm373_vm3, %v361_v17 }
 0x1bc   : > { %v443_v22 = vpop.f32.mrb[0].mxu1 }
 0x1bd   : > { %v444_v23 = vadd.f32 %v597_v21, %v443_v22  ;;  %v630_v24 = vpop.f32.mrb[1].mxu1 }
 0x1bf   : > { %v447_v25 = vmax.f32 %v444_v23, 0.0 }
 0x1c1   : > { %640 = vmatmul.mubr.msk.f32.vlgmr.msra.gmra.mrb[2].mxu0 %vm373_vm3, %v447_v25 }
 0x294   : > { %v528_v27 = vpop.f32.mrb[2].mxu0 }
 0x295   : > { %v529_v28 = vadd.f32 %v599_v26, %v528_v27  ;;  %v641_v29 = vpop.f32.mrb[3].mxu0 }
 0x297   : > { %533 = vst.msk [vmem:[%s273_s13] sm:$0xff] %vm532_vm4, %v529_v28 }
 0x298 PF: > { %s17_s24 = sadd.s32 1, %s671_s24  }
 0x299   : > { %p14_p4 = scmp.ge.s32.totalorder %s17_s24, 4  }
 0x29b   :  { %16 = sbr.rel (!%p14_p4) target bundleno = 1 (0x1), region = 78 }

</bundles_post_ra>
